<compile_context>
chip_gen: v5e
topology: v5e:2x2
jax: 0.10.0
libtpu: 0.0.40
codegen_flags: <defaults>
</compile_context>

<pallas_src>
import functools

import jax
import jax.numpy as jnp
from jax.experimental import pallas as pl
from jax.experimental.pallas import tpu as pltpu

_LN_EPS = 1e-5                       # PyTorch LayerNorm default
_MAX_TL = 4096                       # lane-axis tile over patch positions
_TILE_VMEM_BUDGET = 24 * 1024 * 1024  # double-buffered tile budget (safe for v7x)


def _patch_embed_kernel(p_ref, w_ref, b_ref, g_ref, bt_ref, o_ref):
    """Fused patch projection (GEMM + bias) + LayerNorm over C_out.

    p_ref : (Kp, tl)     transposed patch tile (lanes = patch positions)
    w_ref : (C_out, Kp)  projection weight, VMEM-resident (constant index_map)
    b_ref : (C_out, 1)   conv bias
    g_ref : (C_out, 1)   LayerNorm gamma
    bt_ref: (C_out, 1)   LayerNorm beta
    o_ref : (C_out, tl)  NCHW output tile (lane-dense along patch positions)
    """
    # MXU matmul with f32 accumulation; result is already channel-major (NCHW).
    y = jnp.dot(w_ref[...], p_ref[...], preferred_element_type=jnp.float32)
    y = y + b_ref[...].astype(jnp.float32)

    # LayerNorm over the channel (sublane) axis, f32.
    # One-pass statistics: two independent cross-sublane reduces.
    c_out = y.shape[0]
    inv_c = 1.0 / c_out
    s1 = jnp.sum(y, axis=0, keepdims=True)
    s2 = jnp.sum(y * y, axis=0, keepdims=True)
    mean = s1 * inv_c
    var = jnp.maximum(s2 * inv_c - mean * mean, 0.0)  # guard tiny cancellation
    inv = jax.lax.rsqrt(var + _LN_EPS)
    y = (y - mean) * inv
    y = y * g_ref[...].astype(jnp.float32) + bt_ref[...].astype(jnp.float32)

    o_ref[...] = y.astype(o_ref.dtype)


def _round_up(x, m):
    return ((x + m - 1) // m) * m


def _choose_tile(L, B, kp, c_out, itemsize):
    """Pick the lane-axis tile (patch positions per grid step)."""
    if L <= 512:
        tl = L                       # single full-dim tile (any size allowed)
    else:
        # Keep >= 2 grid points when B == 1 so v7x can split across its 2 TCs.
        min_tiles = 2 if B == 1 else 1
        n_tiles = max(min_tiles, pl.cdiv(L, _MAX_TL))
        tl = _round_up(pl.cdiv(L, n_tiles), 128)
    # Shrink if double-buffered in+out tiles would exceed the VMEM budget
    # (matters on v7x: 64 MiB physical VMEM, 32 MiB scoped default).
    while tl > 256 and 2 * (kp + c_out) * tl * itemsize > _TILE_VMEM_BUDGET:
        tl = _round_up(tl // 2, 128)
    return tl


@functools.partial(jax.jit, static_argnames=("patch_size",))
def patch_embedding_forward(x, weight, bias, gamma, beta, *, patch_size):
    """NCHW [B, C_in, H, W] -> NCHW [B, C_out, ceil(H/p), ceil(W/p)]."""
    p = patch_size
    B, C_in, H, W = x.shape
    C_out = weight.shape[0]

    # even_pad: zero-pad H, W up to multiples of p; skipped when divisible.
    # TODO(synk): even_pad side convention unknown; trailing zero pad assumed.
    pad_h = (-H) % p
    pad_w = (-W) % p
    if pad_h or pad_w:
        x = jnp.pad(x, ((0, 0), (0, 0), (0, pad_h), (0, pad_w)))
    Hp = (H + pad_h) // p
    Wp = (W + pad_w) // p
    L = Hp * Wp
    K = C_in * p * p

    # Dtype-specific sublane quantum for the contraction dim.
    itemsize = jnp.dtype(x.dtype).itemsize
    quantum = {4: 8, 2: 16, 1: 32}.get(itemsize, 8)
    Kp = _round_up(K, quantum)

    tl = _choose_tile(L, B, Kp, C_out, itemsize)
    L_pad = _round_up(L, tl)

    # Transposed im2col: patches_T[b, k, l] with k = (C_in, ph, pw) row-major
    # (matches the OIHW conv-weight flatten) and l = (hp, wp). Single fused
    # XLA pad+transpose; K/L alignment pads fuse into the same pass.
    patches_t = (
        x.reshape(B, C_in, Hp, p, Wp, p)
        .transpose(0, 1, 3, 5, 2, 4)
        .reshape(B, K, L)
    )
    if Kp != K or L_pad != L:
        patches_t = jnp.pad(patches_t, ((0, 0), (0, Kp - K), (0, L_pad - L)))

    # Weight [C_out, C_in, p, p] -> [C_out, Kp]; padded K columns are zero so
    # they do not contribute to the contraction.
    w_ck = weight.reshape(C_out, K)
    if Kp != K:
        w_ck = jnp.pad(w_ck, ((0, 0), (0, Kp - K)))

    b_col = bias.reshape(C_out, 1)
    g_col = gamma.reshape(C_out, 1)
    bt_col = beta.reshape(C_out, 1)

    grid = (B, L_pad // tl)

    out_pad = pl.pallas_call(
        _patch_embed_kernel,
        out_shape=jax.ShapeDtypeStruct((B, C_out, L_pad), x.dtype),
        grid=grid,
        in_specs=[
            pl.BlockSpec((None, Kp, tl), lambda b, l: (b, 0, l)),   # patches_T
            pl.BlockSpec((C_out, Kp), lambda b, l: (0, 0)),         # weight: resident
            pl.BlockSpec((C_out, 1), lambda b, l: (0, 0)),          # bias:   resident
            pl.BlockSpec((C_out, 1), lambda b, l: (0, 0)),          # gamma:  resident
            pl.BlockSpec((C_out, 1), lambda b, l: (0, 0)),          # beta:   resident
        ],
        out_specs=pl.BlockSpec((None, C_out, tl), lambda b, l: (b, 0, l)),
        compiler_params=pltpu.CompilerParams(
            dimension_semantics=("parallel", "parallel"),
            # Explicit scoped-VMEM limit; tiles need only a few MiB, 32 MiB is
            # safe on v5e/v6e (128 MiB physical) and v7x (64 MiB physical).
            vmem_limit_bytes=32 * 1024 * 1024,
        ),
    )(patches_t, w_ck, b_col, g_col, bt_col)

    # Output is already NCHW (channel-major); free reshape only.
    out = out_pad if L_pad == L else out_pad[:, :, :L]
    return out.reshape(B, C_out, Hp, Wp)


def _reference_forward(x, weight, bias, gamma, beta, patch_size, eps=_LN_EPS):
    """Pure-JAX reference (conv + movedim + LayerNorm + movedim)."""
    p = patch_size
    _, _, H, W = x.shape
    pad_h = (-H) % p
    pad_w = (-W) % p
    if pad_h or pad_w:
        x = jnp.pad(x, ((0, 0), (0, 0), (0, pad_h), (0, pad_w)))
    y = jax.lax.conv_general_dilated(
        x.astype(jnp.float32),
        weight.astype(jnp.float32),
        window_strides=(p, p),
        padding="VALID",
        dimension_numbers=("NCHW", "OIHW", "NCHW"),
    )
    y = y + bias.astype(jnp.float32).reshape(1, -1, 1, 1)
    y = jnp.moveaxis(y, 1, -1)
    mean = y.mean(-1, keepdims=True)
    var = ((y - mean) ** 2).mean(-1, keepdims=True)
    y = (y - mean) * jax.lax.rsqrt(var + eps)
    y = y * gamma.astype(jnp.float32) + beta.astype(jnp.float32)
    return jnp.moveaxis(y, -1, 1).astype(x.dtype)


if __name__ == "__main__":
    B, C_in, H, W = 2, 4, 16, 16
    patch_size = 4
    C_out = 32

    key = jax.random.PRNGKey(0)
    kx, kw, kb, kg, kbt, kx2 = jax.random.split(key, 6)
    x = jax.random.normal(kx, (B, C_in, H, W), dtype=jnp.float32)
    weight = 0.1 * jax.random.normal(
        kw, (C_out, C_in, patch_size, patch_size), dtype=jnp.float32)
    bias = 0.1 * jax.random.normal(kb, (C_out,), dtype=jnp.float32)
    gamma = 1.0 + 0.1 * jax.random.normal(kg, (C_out,), dtype=jnp.float32)
    beta = 0.1 * jax.random.normal(kbt, (C_out,), dtype=jnp.float32)

    # Case 1: divisible spatial dims (even_pad skipped).
    out = patch_embedding_forward(x, weight, bias, gamma, beta,
                                  patch_size=patch_size)
    out = jax.block_until_ready(out)
    assert out.shape == (B, C_out, H // patch_size, W // patch_size), out.shape
    ref = _reference_forward(x, weight, bias, gamma, beta, patch_size)
    err = float(jnp.max(jnp.abs(out - ref)))
    assert err < 1e-3, f"case1 max abs error vs reference: {err}"

    # Case 2: non-divisible spatial dims (exercises the even_pad path).
    x2 = jax.random.normal(kx2, (B, C_in, 18, 14), dtype=jnp.float32)
    out2 = patch_embedding_forward(x2, weight, bias, gamma, beta,
                                   patch_size=patch_size)
    out2 = jax.block_until_ready(out2)
    assert out2.shape == (B, C_out, 5, 4), out2.shape
    ref2 = _reference_forward(x2, weight, bias, gamma, beta, patch_size)
    err2 = float(jnp.max(jnp.abs(out2 - ref2)))
    assert err2 < 1e-3, f"case2 max abs error vs reference: {err2}"

    print("KERNEL_OK")
</pallas_src>

<mosaic_0001>
module attributes {stable_mosaic.version = 11 : i64} {
  func.func @_patch_embed_kernel(%arg0: i32, %arg1: i32, %arg2: memref<1x64x16xf32, #tpu.memory_space<vmem>>, %arg3: memref<32x64xf32, #tpu.memory_space<vmem>>, %arg4: memref<32x1xf32, #tpu.memory_space<vmem>>, %arg5: memref<32x1xf32, #tpu.memory_space<vmem>>, %arg6: memref<32x1xf32, #tpu.memory_space<vmem>>, %arg7: memref<1x32x16xf32, #tpu.memory_space<vmem>>) attributes {dimension_semantics = [#tpu.dimension_semantics<parallel>, #tpu.dimension_semantics<parallel>], iteration_bounds = array<i64: 2, 1>, scalar_prefetch = 0 : i64, scratch_operands = 0 : i64, tpu.core_type = #tpu.core_type<tc>, window_params = [{transform_indices = @transform_0, window_bounds = array<i64: 1, 64, 16>}, {pipeline_mode = #tpu.pipeline_mode<synchronous>, transform_indices = @transform_1, window_bounds = array<i64: 32, 64>}, {pipeline_mode = #tpu.pipeline_mode<synchronous>, transform_indices = @transform_2, window_bounds = array<i64: 32, 1>}, {pipeline_mode = #tpu.pipeline_mode<synchronous>, transform_indices = @transform_3, window_bounds = array<i64: 32, 1>}, {pipeline_mode = #tpu.pipeline_mode<synchronous>, transform_indices = @transform_4, window_bounds = array<i64: 32, 1>}, {transform_indices = @transform_5, window_bounds = array<i64: 1, 32, 16>}]} {
    %c0 = arith.constant 0 : index
    %c0_0 = arith.constant 0 : index
    %0 = vector.load %arg3[%c0, %c0_0] : memref<32x64xf32, #tpu.memory_space<vmem>>, vector<32x64xf32>
    %c0_1 = arith.constant 0 : index
    %c0_2 = arith.constant 0 : index
    %c0_3 = arith.constant 0 : index
    %1 = vector.load %arg2[%c0_1, %c0_2, %c0_3] : memref<1x64x16xf32, #tpu.memory_space<vmem>>, vector<1x64x16xf32>
    %2 = vector.shape_cast %1 : vector<1x64x16xf32> to vector<64x16xf32>
    %cst = arith.constant dense<0.000000e+00> : vector<32x16xf32>
    %3 = tpu.matmul %0, %2, %cst {dimension_numbers = #tpu.dot_dimension_numbers<[1], [0], [0], [1], [0, 0, 1, 1], [], []>} : vector<32x64xf32>, vector<64x16xf32>, vector<32x16xf32> -> vector<32x16xf32>
    %c0_4 = arith.constant 0 : index
    %c0_5 = arith.constant 0 : index
    %4 = vector.load %arg4[%c0_4, %c0_5] : memref<32x1xf32, #tpu.memory_space<vmem>>, vector<32x1xf32>
    %5 = vector.broadcast %4 : vector<32x1xf32> to vector<32x16xf32>
    %6 = arith.addf %3, %5 : vector<32x16xf32>
    %cst_6 = arith.constant dense<0.000000e+00> : vector<16xf32>
    %7 = vector.multi_reduction <add>, %6, %cst_6 [0] : vector<32x16xf32> to vector<16xf32>
    %8 = vector.shape_cast %7 : vector<16xf32> to vector<1x16xf32>
    %9 = arith.mulf %6, %6 : vector<32x16xf32>
    %cst_7 = arith.constant dense<0.000000e+00> : vector<16xf32>
    %10 = vector.multi_reduction <add>, %9, %cst_7 [0] : vector<32x16xf32> to vector<16xf32>
    %11 = vector.shape_cast %10 : vector<16xf32> to vector<1x16xf32>
    %cst_8 = arith.constant 3.125000e-02 : f32
    %12 = vector.broadcast %cst_8 : f32 to vector<1x16xf32>
    %13 = arith.mulf %8, %12 : vector<1x16xf32>
    %cst_9 = arith.constant 3.125000e-02 : f32
    %14 = vector.broadcast %cst_9 : f32 to vector<1x16xf32>
    %15 = arith.mulf %11, %14 : vector<1x16xf32>
    %16 = arith.mulf %13, %13 : vector<1x16xf32>
    %17 = arith.subf %15, %16 : vector<1x16xf32>
    %cst_10 = arith.constant 0.000000e+00 : f32
    %18 = vector.broadcast %cst_10 : f32 to vector<1x16xf32>
    %19 = arith.maximumf %17, %18 : vector<1x16xf32>
    %cst_11 = arith.constant 9.99999974E-6 : f32
    %20 = vector.broadcast %cst_11 : f32 to vector<1x16xf32>
    %21 = arith.addf %19, %20 : vector<1x16xf32>
    %22 = math.rsqrt %21 : vector<1x16xf32>
    %23 = vector.broadcast %13 : vector<1x16xf32> to vector<32x16xf32>
    %24 = arith.subf %6, %23 : vector<32x16xf32>
    %25 = vector.broadcast %22 : vector<1x16xf32> to vector<32x16xf32>
    %26 = arith.mulf %24, %25 : vector<32x16xf32>
    %c0_12 = arith.constant 0 : index
    %c0_13 = arith.constant 0 : index
    %27 = vector.load %arg5[%c0_12, %c0_13] : memref<32x1xf32, #tpu.memory_space<vmem>>, vector<32x1xf32>
    %28 = vector.broadcast %27 : vector<32x1xf32> to vector<32x16xf32>
    %29 = arith.mulf %26, %28 : vector<32x16xf32>
    %c0_14 = arith.constant 0 : index
    %c0_15 = arith.constant 0 : index
    %30 = vector.load %arg6[%c0_14, %c0_15] : memref<32x1xf32, #tpu.memory_space<vmem>>, vector<32x1xf32>
    %31 = vector.broadcast %30 : vector<32x1xf32> to vector<32x16xf32>
    %32 = arith.addf %29, %31 : vector<32x16xf32>
    %c0_16 = arith.constant 0 : index
    %c0_17 = arith.constant 0 : index
    %c0_18 = arith.constant 0 : index
    %33 = vector.load %arg7[%c0_16, %c0_17, %c0_18] : memref<1x32x16xf32, #tpu.memory_space<vmem>>, vector<1x32x16xf32>
    %34 = vector.shape_cast %33 : vector<1x32x16xf32> to vector<32x16xf32>
    %35 = vector.shape_cast %32 : vector<32x16xf32> to vector<1x32x16xf32>
    tpu.vector_store %arg7[%c0_16, %c0_17, %c0_18], %35 {strides = array<i32>} : memref<1x32x16xf32, #tpu.memory_space<vmem>>, vector<1x32x16xf32>,
    return
  }
  func.func @transform_0(%arg0: i32, %arg1: i32) -> (i32, i32, i32) {
    %c0_i32 = arith.constant 0 : i32
    %c0_i32_0 = arith.constant 0 : i32
    return %arg0, %c0_i32, %arg1 : i32, i32, i32
  }
  func.func @transform_1(%arg0: i32, %arg1: i32) -> (i32, i32) {
    %c0_i32 = arith.constant 0 : i32
    %c0_i32_0 = arith.constant 0 : i32
    %c0_i32_1 = arith.constant 0 : i32
    return %c0_i32, %c0_i32_0 : i32, i32
  }
  func.func @transform_2(%arg0: i32, %arg1: i32) -> (i32, i32) {
    %c0_i32 = arith.constant 0 : i32
    %c0_i32_0 = arith.constant 0 : i32
    %c0_i32_1 = arith.constant 0 : i32
    return %c0_i32, %c0_i32_0 : i32, i32
  }
  func.func @transform_3(%arg0: i32, %arg1: i32) -> (i32, i32) {
    %c0_i32 = arith.constant 0 : i32
    %c0_i32_0 = arith.constant 0 : i32
    %c0_i32_1 = arith.constant 0 : i32
    return %c0_i32, %c0_i32_0 : i32, i32
  }
  func.func @transform_4(%arg0: i32, %arg1: i32) -> (i32, i32) {
    %c0_i32 = arith.constant 0 : i32
    %c0_i32_0 = arith.constant 0 : i32
    %c0_i32_1 = arith.constant 0 : i32
    return %c0_i32, %c0_i32_0 : i32, i32
  }
  func.func @transform_5(%arg0: i32, %arg1: i32) -> (i32, i32, i32) {
    %c0_i32 = arith.constant 0 : i32
    %c0_i32_0 = arith.constant 0 : i32
    return %arg0, %c0_i32, %arg1 : i32, i32, i32
  }
}

</mosaic_0001>

<bundles_post_ra>
// kernel: patch_embedding_forward.1
= control target key start
LH: loop header
LB: loop body
LE: loop exit
PB: predicated region body
PF: predicated region fallthrough
CT: control target
= control target key end

     0   :  { %s658_s18 = smov 0   ;;  %s660_s19 = smov 0   ;;  %s777_s0 = inlined_call_operand.vmem [shape: f32[2,64,16], index: 0, kind: input, shape index: {}]   ;;  %s778_s1 = inlined_call_operand.vmem [shape: f32[32,64], index: 1, kind: input, shape index: {}]   ;;  %s779_s2 = inlined_call_operand.vmem [shape: f32[32,1], index: 2, kind: input, shape index: {}]   ;;  %s780_s3 = inlined_call_operand.vmem [shape: f32[32,1], index: 3, kind: input, shape index: {}]   ;;  %s781_s4 = inlined_call_operand.vmem [shape: f32[32,1], index: 4, kind: input, shape index: {}]   ;;  %s782_s5 = inlined_call_operand.vmem [shape: f32[2,32,16], index: 5, kind: output, shape index: {}]  }
   0x1   :  { %s662_s20 = smov 0  }
   0x2 LB: > { %s27_s21 = sadd.s32 1, %s621_s19  ;;  %p536_p0 = scmp.ge.s32.totalorder %s625_s20, 1  ;;  %s625_s20 = sphi %s662_s20, %s15_s20   ;;  %s621_s19 = sphi %s660_s19, %s784_s19   ;;  %s617_s18 = sphi %s658_s18, %s783_s18  }
   0x3   : > { %p29_p1 = scmp.ge.s32.totalorder %s27_s21, 2  ;;  %p206_p2 = scmp.lt.s32.totalorder %s625_s20, 3 }
   0x5   : > { %s786_s21 = smov (%p29_p1, %s27_s21), 0  ;;  %p207_p3 = pnand %p536_p0, %p206_p2 }
   0x6   : > { %p240_p4 = scmp.lt.s32.totalorder (!%p207_p3), %s617_s18, 1 }
   0x7   : > { %210 = sbr.rel (%p207_p3) target bundleno = 224 (0xe0), region = 40 }
   0xc   : > { %v268_v0 = vld [vmem:[%s779_s2] sm:$0xff]  ;;  %v270_v1 = vld [vmem:[%s779_s2 + $0x10] sm:$0xff]  ;;  %v627_v2 = vmov 0   ;;  %s788_s18 = smov (!%p240_p4, %s617_s18), 1  ;;  %v269_v7 = vld [vmem:[%s779_s2 + $0x8] sm:$0xff]  ;;  %vm292_vm0 = vcmask 523264  }
   0xd   : > { %598 = vset.pattern.permute.xlu0 %v627_v2  ;;  %599 = vset.pattern.permute.xlu1 %v627_v2  ;;  %s547_s26 = sshll.u32 %s788_s18, 6  ;;  %v389_v3 = vld [vmem:[%s780_s3] sm:$0xff]  ;;  %v271_v10 = vld [vmem:[%s779_s2 + $0x18] sm:$0xff]  ;;  %v391_v13 = vld [vmem:[%s780_s3 + $0x10] sm:$0xff]  ;;  %vm334_vm1 = vcmask 130048   ;;  %s548_s12 = sshll.u32 %s788_s18, 5 }
   0xe   : > { %274 = vperm.xlu0 %598, %v268_v0   ;;  %284 = vperm.xlu1 %599, %v270_v1   ;;  %s691_s6 = scalar_lea.vmem %s777_s0, %s547_s26  ;;  %v256_v15 = vld [vmem:[%s778_s1] sm:$0xff]  ;;  %v257_v16 = vld [vmem:[%s778_s1 + $0x8] sm:$0xff]  ;;  %v258_v17 = vld [vmem:[%s778_s1 + $0x10] sm:$0xff]  ;;  %s255_s15 = scalar_lea.vmem %s782_s5, %s548_s12 }
   0xf   : > { %600 = vset.pattern.permute.xlu2 %v627_v2  ;;  %v267_v4 = vld [vmem:[%s691_s6 + $0x38] sm:$0xff]  ;;  %v266_v5 = vld [vmem:[%s691_s6 + $0x30] sm:$0xff]  ;;  %v265_v6 = vld [vmem:[%s691_s6 + $0x28] sm:$0xff] }
  0x10   : > { %395 = vperm.xlu2 %600, %v389_v3   ;;  %313 = vmatpush.msra.mxu0 %v267_v4  ;;  %v264_v8 = vld [vmem:[%s691_s6 + $0x20] sm:$0xff]  ;;  %v263_v9 = vld [vmem:[%s691_s6 + $0x18] sm:$0xff]  ;;  %v262_v11 = vld [vmem:[%s691_s6 + $0x10] sm:$0xff] }
  0x11   : > { %549 = vmatpush.msra.mxu1 %v267_v4  ;;  %550 = vmatpush.msra.mxu2 %v267_v4  ;;  %v261_v12 = vld [vmem:[%s691_s6 + $0x8] sm:$0xff]  ;;  %v260_v14 = vld [vmem:[%s691_s6] sm:$0xff]  ;;  %v259_v18 = vld [vmem:[%s778_s1 + $0x18] sm:$0xff] }
  0x12   : > { %551 = vmatpush.msra.mxu3 %v267_v4  ;;  %314 = vmatpush.msra.mxu0 %v266_v5  ;;  %v392_v19 = vld [vmem:[%s780_s3 + $0x18] sm:$0xff]  ;;  %v390_v20 = vld [vmem:[%s780_s3 + $0x8] sm:$0xff]  ;;  %v419_v22 = vld [vmem:[%s781_s4 + $0x10] sm:$0xff] }
  0x13   : > { %552 = vmatpush.msra.mxu1 %v266_v5  ;;  %553 = vmatpush.msra.mxu2 %v266_v5  ;;  %v418_v21 = vld [vmem:[%s781_s4 + $0x8] sm:$0xff]  ;;  %v417_v23 = vld [vmem:[%s781_s4] sm:$0xff]  ;;  %v420_v24 = vld [vmem:[%s781_s4 + $0x18] sm:$0xff] }
  0x14   : > { %554 = vmatpush.msra.mxu3 %v266_v5  ;;  %315 = vmatpush.msra.mxu0 %v265_v6 }
  0x15   : > { %555 = vmatpush.msra.mxu1 %v265_v6  ;;  %556 = vmatpush.msra.mxu2 %v265_v6 }
  0x16   : > { %557 = vmatpush.msra.mxu3 %v265_v6  ;;  %279 = vperm.xlu0 %598, %v269_v7  }
  0x17   : > { %316 = vmatpush.msra.mxu0 %v264_v8  ;;  %558 = vmatpush.msra.mxu1 %v264_v8 }
  0x18   : > { %559 = vmatpush.msra.mxu2 %v264_v8  ;;  %560 = vmatpush.msra.mxu3 %v264_v8 }
  0x19   : > { %317 = vmatpush.msra.mxu0 %v263_v9  ;;  %561 = vmatpush.msra.mxu1 %v263_v9 }
  0x1a   : > { %562 = vmatpush.msra.mxu2 %v263_v9  ;;  %563 = vmatpush.msra.mxu3 %v263_v9 }
  0x1b   : > { %289 = vperm.xlu1 %599, %v271_v10   ;;  %318 = vmatpush.msra.mxu0 %v262_v11 }
  0x1c   : > { %564 = vmatpush.msra.mxu1 %v262_v11  ;;  %565 = vmatpush.msra.mxu2 %v262_v11 }
  0x1d   : > { %566 = vmatpush.msra.mxu3 %v262_v11  ;;  %319 = vmatpush.msra.mxu0 %v261_v12 }
  0x1e   : > { %567 = vmatpush.msra.mxu1 %v261_v12  ;;  %568 = vmatpush.msra.mxu2 %v261_v12 }
  0x1f   : > { %569 = vmatpush.msra.mxu3 %v261_v12  ;;  %405 = vperm.xlu0 %598, %v391_v13  }
  0x20   : > { %320 = vmatpush.msra.mxu0 %v260_v14  ;;  %570 = vmatpush.msra.mxu1 %v260_v14 }
  0x21   : > { %571 = vmatpush.msra.mxu2 %v260_v14  ;;  %572 = vmatpush.msra.mxu3 %v260_v14 }
  0x22   : > { %541 = vmatmul.msk.f32.vlgmr.msra.gmra.mxu0 %vm292_vm0, %v256_v15  ;;  %542 = vmatmul.msk.f32.vlgmr.msra.gmra.mxu1 %vm292_vm0, %v257_v16 }
  0x23   : > { %543 = vmatmul.msk.f32.vlgmr.msra.gmra.mxu2 %vm292_vm0, %v258_v17  ;;  %544 = vmatmul.msk.f32.vlgmr.msra.gmra.mxu3 %vm292_vm0, %v259_v18 }
  0x24   : > { %410 = vperm.xlu1 %599, %v392_v19   ;;  %400 = vperm.xlu2 %600, %v390_v20  }
  0x27   : > { %428 = vperm.xlu0 %598, %v418_v21  }
  0x2c   : > { %433 = vperm.xlu1 %599, %v419_v22   ;;  %423 = vperm.xlu2 %600, %v417_v23  }
  0x34   : > { %438 = vperm.xlu2 %600, %v420_v24  }
  0x6a   : > { %v396_v5 = vpop.permute.xlu2 %395 }
  0x7e   : > { %v401_v10 = vpop.permute.xlu2 %400 }
  0x80   : > { %v275_v25 = vpop.permute.xlu0 %274  ;;  %v285_v26 = vpop.permute.xlu1 %284 }
  0x86   : > { %v424_v17 = vpop.permute.xlu2 %423 }
  0x88   : > { %v280_v28 = vpop.permute.xlu0 %279 }
  0x8d   : > { %v290_v37 = vpop.permute.xlu1 %289 }
  0x91   : > { %v406_v14 = vpop.permute.xlu0 %405 }
  0x96   : > { %v411_v15 = vpop.permute.xlu1 %410 }
  0x9f   : > { %v322_v27 = vpop.f32.mrf.mxu0  ;;  %v325_v30 = vpop.f32.mrf.mxu1 }
  0xa0   : > { %v740_v29 = vadd.f32 %v322_v27, %v275_v25  ;;  %v742_v31 = vadd.f32 %v325_v30, %v280_v28 }
  0xa2   : > { %v348_v32 = vmul.f32 %v740_v29, %v740_v29  ;;  %v349_v33 = vmul.f32 %v742_v31, %v742_v31  ;;  %v335_v34 = vsel %vm334_vm1, %v740_v29, 0.0  ;;  %v336_v35 = vsel %vm334_vm1, %v742_v31, 0.0 }
  0xa3   : > { %v337_v42 = vadd.f32 %v336_v35, %v335_v34  ;;  %v429_v35 = vpop.permute.xlu0 %428 }
  0xa4   : > { %v352_v38 = vsel %vm334_vm1, %v348_v32, 0.0  ;;  %v353_v39 = vsel %vm334_vm1, %v349_v33, 0.0 }
  0xa5   : > { %v354_v46 = vadd.f32 %v353_v39, %v352_v38 }
  0xa6   : > { %v328_v36 = vpop.f32.mrf.mxu2  ;;  %v331_v41 = vpop.f32.mrf.mxu3 }
  0xa7   : > { %v329_v40 = vadd.f32 %v328_v36, %v285_v26  ;;  %v332_v43 = vadd.f32 %v331_v41, %v290_v37  ;;  %v434_v36 = vpop.permute.xlu1 %433 }
  0xa9   : > { %v338_v44 = vsel %vm334_vm1, %v329_v40, 0.0  ;;  %v350_v45 = vmul.f32 %v329_v40, %v329_v40  ;;  %v351_v48 = vmul.f32 %v332_v43, %v332_v43  ;;  %v340_v50 = vsel %vm334_vm1, %v332_v43, 0.0 }
  0xaa   : > { %v339_v47 = vadd.f32 %v338_v44, %v337_v42 }
  0xab   : > { %v355_v49 = vsel %vm334_vm1, %v350_v45, 0.0  ;;  %v357_v53 = vsel %vm334_vm1, %v351_v48, 0.0 }
  0xac   : > { %v356_v51 = vadd.f32 %v355_v49, %v354_v46  ;;  %v341_v52 = vadd.f32 %v340_v50, %v339_v47 }
  0xae   : > { %v342_v54 = vrot.slane %v341_v52, 4  ;;  %v358_v55 = vadd.f32 %v357_v53, %v356_v51 }
  0xb0   : > { %v343_v56 = vadd.f32 %v342_v54, %v341_v52  ;;  %v359_v57 = vrot.slane %v358_v55, 4 }
  0xb2   : > { %v344_v58 = vrot.slane %v343_v56, 2  ;;  %v360_v59 = vadd.f32 %v359_v57, %v358_v55 }
  0xb4   : > { %v345_v60 = vadd.f32 %v344_v58, %v343_v56  ;;  %v361_v61 = vrot.slane %v360_v59, 2 }
  0xb6   : > { %v346_v62 = vrot.slane %v345_v60, 1  ;;  %v362_v63 = vadd.f32 %v361_v61, %v360_v59 }
  0xb8   : > { %v347_v0 = vadd.f32 %v346_v62, %v345_v60  ;;  %v363_v1 = vrot.slane %v362_v63, 1 }
  0xba   : > { %v364_v2 = vadd.f32 %v363_v1, %v362_v63  ;;  %v365_v3 = vmul.f32 0.03125, %v347_v0 }
  0xbc   : > { %v366_v4 = vmul.f32 0.03125, %v364_v2  ;;  %v367_v6 = vmul.f32 %v365_v3, %v365_v3  ;;  %v384_v20 = vsub.f32 %v332_v43, %v365_v3  ;;  %v381_v21 = vsub.f32 %v740_v29, %v365_v3 }
  0xbd   : > { %v383_v22 = vsub.f32 %v329_v40, %v365_v3  ;;  %v382_v23 = vsub.f32 %v742_v31, %v365_v3  ;;  %v439_v31 = vpop.permute.xlu2 %438 }
  0xbe   : > { %v368_v7 = vsub.f32 %v366_v4, %v367_v6 }
  0xc0   : > { %v369_v8 = vmax.f32 %v368_v7, 0.0 }
  0xc2   : > { %v370_v9 = vadd.f32 1e-05, %v369_v8 }
  0xc4   : > { %601 = vrsqrt.f32 %v370_v9  ;;  %vm377_vm3 = vweird.f32 %v370_v9 }
  0xca   : > { %v602_v11 = vpop.eup %601 }
  0xcb   : > { %v372_v12 = vmul.f32 %v602_v11, %v370_v9  ;;  %vm378_vm2 = vweird.f32 %v602_v11 }
  0xcc   : > { %vm379_vm4 = vmor %vm377_vm3, %vm378_vm2 }
  0xcd   : > { %v373_v13 = vmul.f32 %v602_v11, %v372_v12 }
  0xcf   : > { %v374_v16 = vmul.f32 0.5, %v373_v13 }
  0xd1   : > { %v375_v18 = vsub.f32 1.5, %v374_v16 }
  0xd3   : > { %v376_v19 = vmul.f32 %v602_v11, %v375_v18 }
  0xd5   : > { %v380_v24 = vsel %vm379_vm4, %v602_v11, %v376_v19 }
  0xd6   : > { %v385_v25 = vmul.f32 %v381_v21, %v380_v24  ;;  %v387_v26 = vmul.f32 %v383_v22, %v380_v24  ;;  %v386_v27 = vmul.f32 %v382_v23, %v380_v24  ;;  %v388_v28 = vmul.f32 %v384_v20, %v380_v24 }
  0xd8   : > { %v413_v30 = vmul.f32 %v396_v5, %v385_v25  ;;  %v415_v32 = vmul.f32 %v406_v14, %v387_v26  ;;  %v414_v33 = vmul.f32 %v401_v10, %v386_v27  ;;  %v416_v34 = vmul.f32 %v411_v15, %v388_v28 }
  0xda   : > { %v443_v29 = vadd.f32 %v434_v36, %v415_v32  ;;  %v442_v37 = vadd.f32 %v429_v35, %v414_v33  ;;  %v441_v38 = vadd.f32 %v424_v17, %v413_v30  ;;  %v444_v39 = vadd.f32 %v439_v31, %v416_v34 }
  0xdc   : > { %446 = vst.msk [vmem:[%s255_s15 + $0x8] sm:$0xff] %vm334_vm1, %v442_v37 }
  0xdd   : > { %447 = vst.msk [vmem:[%s255_s15 + $0x10] sm:$0xff] %vm334_vm1, %v443_v29 }
  0xde   : > { %445 = vst.msk [vmem:[%s255_s15] sm:$0xff] %vm334_vm1, %v441_v38 }
  0xdf   : > { %448 = vst.msk [vmem:[%s255_s15 + $0x18] sm:$0xff] %vm334_vm1, %v444_v39 }
  0xe0 PF: > { %s15_s20 = sadd.s32 1, %s625_s20   ;;  %s783_s18 = smov %s621_s19 }
  0xe1   : > { %p12_p5 = scmp.ge.s32.totalorder %s15_s20, 4   ;;  %s784_s19 = smov %s786_s21 }
  0xe3   :  { %14 = sbr.rel (!%p12_p5) target bundleno = 2 (0x2), region = 70 }

</bundles_post_ra>
